<compile_context>
chip_gen: v6e
topology: v6e:2x2x1
jax: 0.10.0
libtpu: 0.0.40
codegen_flags: <defaults>
</compile_context>

<pallas_src>
import jax
import jax.numpy as jnp
from jax import lax
from jax.experimental import pallas as pl
from jax.experimental.pallas import tpu as pltpu


def bundler_kernel(h_ref, c_ref, wmu_ref, wls_ref, weps_ref,
                   bmu_ref, bls_ref, beps_ref, o_ref):
    """Fused: sample Bayesian W/b, (h|c) @ W + b, row L2-normalize, ReLU."""
    f = h_ref.shape[1]                      # in_feats (static)

    # --- Bayesian sampling fused in-kernel (EUP exp + VPU mul/add) ---------
    w = wmu_ref[...] + jnp.exp(wls_ref[...]) * weps_ref[...]      # [2F, O]
    b = bmu_ref[...] + jnp.exp(bls_ref[...]) * beps_ref[...]      # [1, O]

    # --- cat([h, c], 1) @ W  ==  h @ W[:F] + c @ W[F:]  (no concat copy) ---
    z = jnp.dot(h_ref[...], w[:f, :], preferred_element_type=jnp.float32)
    z = z + jnp.dot(c_ref[...], w[f:, :], preferred_element_type=jnp.float32)
    z = z + b                                                     # [tile, O]

    # --- F.normalize(z, p=2, dim=1):  z * rsqrt(max(sum(z^2), 1e-24)) ------
    sq = jnp.sum(z * z, axis=1, keepdims=True)
    inv = lax.rsqrt(jnp.maximum(sq, 1e-24))                       # == 1/max(||z||,1e-12)
    z = z * inv

    # --- activation = ReLU --------------------------------------------------
    # TODO(synk): `activation` is a constructor argument in the PyTorch module;
    # ReLU is hard-wired here.  Dropout is defined but never used in forward.
    o_ref[...] = jnp.maximum(z, 0.0).astype(o_ref.dtype)


def bayes_bundler_forward(h, c, weight_mu, weight_log_sigma, bias_mu,
                          bias_log_sigma, w_eps, b_eps, *, tile_rows=128):
    """Wrapper: pad rows to the tile, run the fused Pallas kernel over a row grid."""
    n, in_feats = h.shape
    two_f, out_feats = weight_mu.shape
    assert two_f == 2 * in_feats

    # Pad the node/row dimension to a multiple of the row tile.
    n_tiles = pl.cdiv(n, tile_rows)
    n_pad = n_tiles * tile_rows
    if n_pad != n:
        pad = ((0, n_pad - n), (0, 0))
        h = jnp.pad(h, pad)
        c = jnp.pad(c, pad)

    row_spec = pl.BlockSpec((tile_rows, in_feats), lambda i: (i, 0))
    w_spec = pl.BlockSpec((two_f, out_feats), lambda i: (0, 0))       # resident
    b_spec = pl.BlockSpec((1, out_feats), lambda i: (0, 0))           # resident

    out = pl.pallas_call(
        bundler_kernel,
        out_shape=jax.ShapeDtypeStruct((n_pad, out_feats), jnp.float32),
        grid_spec=pltpu.PrefetchScalarGridSpec(
            num_scalar_prefetch=0,
            grid=(n_tiles,),
            in_specs=[row_spec, row_spec,                 # h, c
                      w_spec, w_spec, w_spec,             # weight mu / log_sigma / eps
                      b_spec, b_spec, b_spec],            # bias   mu / log_sigma / eps
            out_specs=pl.BlockSpec((tile_rows, out_feats), lambda i: (i, 0)),
        ),
        compiler_params=pltpu.CompilerParams(
            dimension_semantics=("parallel",)),
    )(h, c, weight_mu, weight_log_sigma, w_eps, bias_mu, bias_log_sigma, b_eps)

    return out[:n]


def reference_forward(h, c, weight_mu, weight_log_sigma, bias_mu,
                      bias_log_sigma, w_eps, b_eps):
    """Pure-JAX reference of the same math, for a sanity check."""
    w = weight_mu + jnp.exp(weight_log_sigma) * w_eps
    b = bias_mu + jnp.exp(bias_log_sigma) * b_eps
    x = jnp.concatenate([h, c], axis=1)
    z = x @ w + b
    norm = jnp.maximum(jnp.linalg.norm(z, axis=1, keepdims=True), 1e-12)
    z = z / norm
    return jnp.maximum(z, 0.0)


def _make_inputs(key, n, in_feats, out_feats):
    two_f = 2 * in_feats
    k_h, k_c, k_wmu, k_bmu, k_weps, k_beps = jax.random.split(key, 6)

    h = jax.random.normal(k_h, (n, in_feats), dtype=jnp.float32)
    c = jax.random.normal(k_c, (n, in_feats), dtype=jnp.float32)

    # BayesLinear(prior_mu=0, prior_sigma=0.1, in=2*in_feats, out=out_feats).
    bound = 1.0 / jnp.sqrt(jnp.float32(two_f))
    weight_mu = jax.random.uniform(k_wmu, (two_f, out_feats),
                                   minval=-bound, maxval=bound, dtype=jnp.float32)
    weight_log_sigma = jnp.full((two_f, out_feats), jnp.log(0.1), jnp.float32)
    bias_mu = jax.random.uniform(k_bmu, (1, out_feats),
                                 minval=-bound, maxval=bound, dtype=jnp.float32)
    bias_log_sigma = jnp.full((1, out_feats), jnp.log(0.1), jnp.float32)

    # Deterministic "sampled" eps for the Bayesian forward pass.
    w_eps = jax.random.normal(k_weps, (two_f, out_feats), dtype=jnp.float32)
    b_eps = jax.random.normal(k_beps, (1, out_feats), dtype=jnp.float32)

    return (h, c, weight_mu, weight_log_sigma, bias_mu, bias_log_sigma,
            w_eps, b_eps)


if __name__ == "__main__":
    in_feats = 64          # per-tensor feature size -> 2*in_feats = 128 (K)
    out_feats = 128

    key = jax.random.PRNGKey(0)
    k_big, k_small = jax.random.split(key, 2)

    # Batched case: many nodes so the row grid / MXU actually engage.
    args_big = _make_inputs(k_big, 512, in_feats, out_feats)
    out_big = jax.block_until_ready(bayes_bundler_forward(*args_big))
    ref_big = reference_forward(*args_big)
    assert out_big.shape == (512, out_feats)
    assert jnp.allclose(out_big, ref_big, atol=1e-4, rtol=1e-4), "mismatch (N=512)"

    # Small / ragged case (exercises the row-padding path, original N=8 usage).
    args_small = _make_inputs(k_small, 8, in_feats, out_feats)
    out_small = jax.block_until_ready(bayes_bundler_forward(*args_small))
    ref_small = reference_forward(*args_small)
    assert out_small.shape == (8, out_feats)
    assert jnp.allclose(out_small, ref_small, atol=1e-4, rtol=1e-4), "mismatch (N=8)"

    print("KERNEL_OK")
</pallas_src>

<mosaic_0001>
module attributes {stable_mosaic.version = 11 : i64} {
  func.func @bundler_kernel(%arg0: i32, %arg1: memref<128x64xf32, #tpu.memory_space<vmem>>, %arg2: memref<128x64xf32, #tpu.memory_space<vmem>>, %arg3: memref<128x128xf32, #tpu.memory_space<vmem>>, %arg4: memref<128x128xf32, #tpu.memory_space<vmem>>, %arg5: memref<128x128xf32, #tpu.memory_space<vmem>>, %arg6: memref<1x128xf32, #tpu.memory_space<vmem>>, %arg7: memref<1x128xf32, #tpu.memory_space<vmem>>, %arg8: memref<1x128xf32, #tpu.memory_space<vmem>>, %arg9: memref<128x128xf32, #tpu.memory_space<vmem>>) attributes {dimension_semantics = [#tpu.dimension_semantics<parallel>], iteration_bounds = array<i64: 4>, scalar_prefetch = 0 : i64, scratch_operands = 0 : i64, tpu.core_type = #tpu.core_type<tc>, window_params = [{transform_indices = @transform_0, window_bounds = array<i64: 128, 64>}, {transform_indices = @transform_1, window_bounds = array<i64: 128, 64>}, {pipeline_mode = #tpu.pipeline_mode<synchronous>, transform_indices = @transform_2, window_bounds = array<i64: 128, 128>}, {pipeline_mode = #tpu.pipeline_mode<synchronous>, transform_indices = @transform_3, window_bounds = array<i64: 128, 128>}, {pipeline_mode = #tpu.pipeline_mode<synchronous>, transform_indices = @transform_4, window_bounds = array<i64: 128, 128>}, {pipeline_mode = #tpu.pipeline_mode<synchronous>, transform_indices = @transform_5, window_bounds = array<i64: 1, 128>}, {pipeline_mode = #tpu.pipeline_mode<synchronous>, transform_indices = @transform_6, window_bounds = array<i64: 1, 128>}, {pipeline_mode = #tpu.pipeline_mode<synchronous>, transform_indices = @transform_7, window_bounds = array<i64: 1, 128>}, {transform_indices = @transform_8, window_bounds = array<i64: 128, 128>}]} {
    %c0 = arith.constant 0 : index
    %c0_0 = arith.constant 0 : index
    %0 = vector.load %arg3[%c0, %c0_0] : memref<128x128xf32, #tpu.memory_space<vmem>>, vector<128x128xf32>
    %c0_1 = arith.constant 0 : index
    %c0_2 = arith.constant 0 : index
    %1 = vector.load %arg4[%c0_1, %c0_2] : memref<128x128xf32, #tpu.memory_space<vmem>>, vector<128x128xf32>
    %2 = math.exp %1 : vector<128x128xf32>
    %c0_3 = arith.constant 0 : index
    %c0_4 = arith.constant 0 : index
    %3 = vector.load %arg5[%c0_3, %c0_4] : memref<128x128xf32, #tpu.memory_space<vmem>>, vector<128x128xf32>
    %4 = arith.mulf %2, %3 : vector<128x128xf32>
    %5 = arith.addf %0, %4 : vector<128x128xf32>
    %c0_5 = arith.constant 0 : index
    %c0_6 = arith.constant 0 : index
    %6 = vector.load %arg6[%c0_5, %c0_6] : memref<1x128xf32, #tpu.memory_space<vmem>>, vector<1x128xf32>
    %c0_7 = arith.constant 0 : index
    %c0_8 = arith.constant 0 : index
    %7 = vector.load %arg7[%c0_7, %c0_8] : memref<1x128xf32, #tpu.memory_space<vmem>>, vector<1x128xf32>
    %8 = math.exp %7 : vector<1x128xf32>
    %c0_9 = arith.constant 0 : index
    %c0_10 = arith.constant 0 : index
    %9 = vector.load %arg8[%c0_9, %c0_10] : memref<1x128xf32, #tpu.memory_space<vmem>>, vector<1x128xf32>
    %10 = arith.mulf %8, %9 : vector<1x128xf32>
    %11 = arith.addf %6, %10 : vector<1x128xf32>
    %c0_11 = arith.constant 0 : index
    %c0_12 = arith.constant 0 : index
    %12 = vector.load %arg1[%c0_11, %c0_12] : memref<128x64xf32, #tpu.memory_space<vmem>>, vector<128x64xf32>
    %13 = vector.extract_strided_slice %5 {offsets = [0, 0], sizes = [64, 128], strides = [1, 1]} : vector<128x128xf32> to vector<64x128xf32>
    %cst = arith.constant dense<0.000000e+00> : vector<128x128xf32>
    %14 = tpu.matmul %12, %13, %cst {dimension_numbers = #tpu.dot_dimension_numbers<[1], [0], [0], [1], [0, 0, 1, 1], [], []>} : vector<128x64xf32>, vector<64x128xf32>, vector<128x128xf32> -> vector<128x128xf32>
    %c0_13 = arith.constant 0 : index
    %c0_14 = arith.constant 0 : index
    %15 = vector.load %arg2[%c0_13, %c0_14] : memref<128x64xf32, #tpu.memory_space<vmem>>, vector<128x64xf32>
    %16 = vector.extract_strided_slice %5 {offsets = [64, 0], sizes = [64, 128], strides = [1, 1]} : vector<128x128xf32> to vector<64x128xf32>
    %cst_15 = arith.constant dense<0.000000e+00> : vector<128x128xf32>
    %17 = tpu.matmul %15, %16, %cst_15 {dimension_numbers = #tpu.dot_dimension_numbers<[1], [0], [0], [1], [0, 0, 1, 1], [], []>} : vector<128x64xf32>, vector<64x128xf32>, vector<128x128xf32> -> vector<128x128xf32>
    %18 = arith.addf %14, %17 : vector<128x128xf32>
    %19 = vector.broadcast %11 : vector<1x128xf32> to vector<128x128xf32>
    %20 = arith.addf %18, %19 : vector<128x128xf32>
    %21 = arith.mulf %20, %20 : vector<128x128xf32>
    %cst_16 = arith.constant dense<0.000000e+00> : vector<128xf32>
    %22 = vector.multi_reduction <add>, %21, %cst_16 [1] : vector<128x128xf32> to vector<128xf32>
    %23 = vector.shape_cast %22 : vector<128xf32> to vector<128x1xf32>
    %cst_17 = arith.constant 1.000000e-24 : f32
    %24 = vector.broadcast %cst_17 : f32 to vector<128x1xf32>
    %25 = arith.maximumf %23, %24 : vector<128x1xf32>
    %26 = math.rsqrt %25 : vector<128x1xf32>
    %27 = vector.broadcast %26 : vector<128x1xf32> to vector<128x128xf32>
    %28 = arith.mulf %20, %27 : vector<128x128xf32>
    %cst_18 = arith.constant 0.000000e+00 : f32
    %29 = vector.broadcast %cst_18 : f32 to vector<128x128xf32>
    %30 = arith.maximumf %28, %29 : vector<128x128xf32>
    %c0_19 = arith.constant 0 : index
    %c0_20 = arith.constant 0 : index
    %31 = vector.load %arg9[%c0_19, %c0_20] : memref<128x128xf32, #tpu.memory_space<vmem>>, vector<128x128xf32>
    tpu.vector_store %arg9[%c0_19, %c0_20], %30 {strides = array<i32>} : memref<128x128xf32, #tpu.memory_space<vmem>>, vector<128x128xf32>,
    return
  }
  func.func @transform_0(%arg0: i32) -> (i32, i32) {
    %c0_i32 = arith.constant 0 : i32
    %c0_i32_0 = arith.constant 0 : i32
    return %arg0, %c0_i32 : i32, i32
  }
  func.func @transform_1(%arg0: i32) -> (i32, i32) {
    %c0_i32 = arith.constant 0 : i32
    %c0_i32_0 = arith.constant 0 : i32
    return %arg0, %c0_i32 : i32, i32
  }
  func.func @transform_2(%arg0: i32) -> (i32, i32) {
    %c0_i32 = arith.constant 0 : i32
    %c0_i32_0 = arith.constant 0 : i32
    %c0_i32_1 = arith.constant 0 : i32
    return %c0_i32, %c0_i32_0 : i32, i32
  }
  func.func @transform_3(%arg0: i32) -> (i32, i32) {
    %c0_i32 = arith.constant 0 : i32
    %c0_i32_0 = arith.constant 0 : i32
    %c0_i32_1 = arith.constant 0 : i32
    return %c0_i32, %c0_i32_0 : i32, i32
  }
  func.func @transform_4(%arg0: i32) -> (i32, i32) {
    %c0_i32 = arith.constant 0 : i32
    %c0_i32_0 = arith.constant 0 : i32
    %c0_i32_1 = arith.constant 0 : i32
    return %c0_i32, %c0_i32_0 : i32, i32
  }
  func.func @transform_5(%arg0: i32) -> (i32, i32) {
    %c0_i32 = arith.constant 0 : i32
    %c0_i32_0 = arith.constant 0 : i32
    %c0_i32_1 = arith.constant 0 : i32
    return %c0_i32, %c0_i32_0 : i32, i32
  }
  func.func @transform_6(%arg0: i32) -> (i32, i32) {
    %c0_i32 = arith.constant 0 : i32
    %c0_i32_0 = arith.constant 0 : i32
    %c0_i32_1 = arith.constant 0 : i32
    return %c0_i32, %c0_i32_0 : i32, i32
  }
  func.func @transform_7(%arg0: i32) -> (i32, i32) {
    %c0_i32 = arith.constant 0 : i32
    %c0_i32_0 = arith.constant 0 : i32
    %c0_i32_1 = arith.constant 0 : i32
    return %c0_i32, %c0_i32_0 : i32, i32
  }
  func.func @transform_8(%arg0: i32) -> (i32, i32) {
    %c0_i32 = arith.constant 0 : i32
    %c0_i32_0 = arith.constant 0 : i32
    return %arg0, %c0_i32 : i32, i32
  }
}

</mosaic_0001>

<bundles_post_ra>
// kernel: tpu_custom_call.1
= control target key start
LH: loop header
LB: loop body
LE: loop exit
PB: predicated region body
PF: predicated region fallthrough
CT: control target
= control target key end

     0   :  { %13 = vsyncpa [#allocation3], 0  ;;  %s1943_s0 = inlined_call_operand.vmem [shape: f32[512,64], index: 0, kind: input, shape index: {}]   ;;  %s1944_s1 = inlined_call_operand.vmem [shape: f32[512,64], index: 1, kind: input, shape index: {}]   ;;  %s1945_s2 = inlined_call_operand.vmem [shape: f32[128,128], index: 2, kind: input, shape index: {}]   ;;  %s1946_s3 = inlined_call_operand.vmem [shape: f32[128,128], index: 3, kind: input, shape index: {}]   ;;  %s1947_s4 = inlined_call_operand.vmem [shape: f32[128,128], index: 4, kind: input, shape index: {}]   ;;  %s1948_s5 = inlined_call_operand.vmem [shape: f32[1,128], index: 5, kind: input, shape index: {}]   ;;  %s1949_s6 = inlined_call_operand.vmem [shape: f32[1,128], index: 6, kind: input, shape index: {}]   ;;  %s1950_s7 = inlined_call_operand.vmem [shape: f32[1,128], index: 7, kind: input, shape index: {}]   ;;  %s1951_s8 = inlined_call_operand.hbm [shape: f32[512,128], index: 8, kind: output, shape index: {}]  }
   0x1   :  { %15 = vsyncpa [#allocation3 + $0x1], 0  ;;  %s1497_s27 = smov 0   ;;  %s1499_s28 = smov 0  }
   0x2   :  { %s1501_s29 = smov 0   ;;  %s1503_s30 = smov 0  }
   0x3 LB: > { %s1518_s9 = sadd.s32 4294967295, %s1447_s30   ;;  %s1105_s10 = sadd.s32 4294967294, %s1447_s30   ;;  %s1447_s30 = sphi %s1503_s30, %s1957_s30   ;;  %s1443_s29 = sphi %s1501_s29, %s1956_s29   ;;  %s1439_s28 = sphi %s1499_s28, %s1955_s28   ;;  %s1435_s27 = sphi %s1497_s27, %s1954_s27  }
   0x4   : > { %s1522_s11 = sadd.s32 1, %s1447_s30   ;;  %s206_s12 = sadd.s32 1, %s1443_s29 }
   0x5   : > { %s203_s13 = ssub.s32 %s1447_s30, %s1522_s11  ;;  %p216_p0 = scmp.ne.s32.totalorder %s1443_s29, %s1439_s28 }
   0x6   : > { %p204_p1 = scmp.eq.s32.totalorder %s203_s13, 0  ;;  %p217_p2 = scmp.eq.s32.totalorder %s1518_s9, 3 }
   0x7   : > { %p222_p3 = scmp.ne.s32.totalorder %s1439_s28, %s1435_s27  ;;  %p223_p4 = scmp.eq.s32.totalorder %s1105_s10, 3 }
   0x8   : > { %s1533_s14 = scalar_select %p204_p1, %s1443_s29, %s206_s12  }
   0x9   : > { %p1535_p5 = por %p217_p2, %p216_p0  ;;  %p1539_p6 = por %p223_p4, %p222_p3 }
   0xa   : > { %p1108_p7 = scmp.ge.s32.totalorder %s1447_s30, 1  ;;  %p277_p8 = scmp.lt.s32.totalorder %s1447_s30, 5 }
   0xc   : > { %p278_p9 = pnand %p1108_p7, %p277_p8 }
   0xd   : > { %s1110_s19 = sshll.u32 (!%p278_p9), %s1518_s9, 4  ;;  %s313_s23 = sand.u32 (!%p278_p9), 1, %s1439_s28  }
   0xe   : > { %281 = sbr.rel (%p278_p9) target bundleno = 460 (0x1cc), region = 52  ;;  %p317_p10 = scmp.lt.s32.totalorder (!%p278_p9), %s1110_s19, 63 }
   0xf   : > { %s1151_s25 = sshll.u32 (!%p278_p9), %s1518_s9, 11  ;;  %s1903_s9 = scalar_lea.sflag (!%p278_p9), [#allocation3], %s313_s23 }
  0x10   : > { %s1895_s18 = scalar_lea.hbm (!%p278_p9), %s1951_s8, %s1151_s25  ;;  %s1449_s21 = smov (!%p278_p9), [#allocation2]  }
  0x11   : > { %s1391_s22 = sshll.u32 (!%p278_p9), %s1449_s21, 4  ;;  %s1392_s22 = int_to_ptr.vmem [resolvable:$false] %s1391_s22 }
  0x13   : > { %v360_v0 = vld [vmem:[%s1946_s3 + $0x78] sm:$0xff]  ;;  %v359_v4 = vld [vmem:[%s1946_s3 + $0x70] sm:$0xff]  ;;  %v358_v8 = vld [vmem:[%s1946_s3 + $0x68] sm:$0xff]  ;;  %s1959_s19 = smov (!%p317_p10, %s1110_s19), 63  ;;  %vm480_vm0 = vcmask 523264  }
  0x14   : > { %v391_v1 = vmul.f32 1.442695, %v360_v0  ;;  %v352_v2 = vld [vmem:[%s1946_s3 + $0x38] sm:$0xff]  ;;  %v389_v5 = vmul.f32 1.442695, %v359_v4  ;;  %v351_v6 = vld [vmem:[%s1946_s3 + $0x30] sm:$0xff] }
  0x15   : > { %v375_v3 = vmul.f32 1.442695, %v352_v2  ;;  %v373_v7 = vmul.f32 1.442695, %v351_v6  ;;  %v387_v9 = vmul.f32 1.442695, %v358_v8 }
  0x16   : > { %1321 = vpow2.f32 %v391_v1  ;;  %v350_v10 = vld [vmem:[%s1946_s3 + $0x28] sm:$0xff]  ;;  %v357_v12 = vld [vmem:[%s1946_s3 + $0x60] sm:$0xff]  ;;  %v356_v16 = vld [vmem:[%s1946_s3 + $0x58] sm:$0xff]  ;;  %s1111_s12 = sshll.u32 %s1959_s19, 3  ;;  %s1109_s19 = sshll.u32 %s313_s23, 7 }
  0x17   : > { %1323 = vpow2.f32 %v375_v3  ;;  %v371_v11 = vmul.f32 1.442695, %v350_v10  ;;  %v385_v13 = vmul.f32 1.442695, %v357_v12  ;;  %v349_v14 = vld [vmem:[%s1946_s3 + $0x20] sm:$0xff]  ;;  %v348_v18 = vld [vmem:[%s1946_s3 + $0x18] sm:$0xff]  ;;  %s1591_s24 = scalar_lea.vmem %s1944_s1, %s1111_s12  ;;  %s1596_s10 = scalar_lea.vmem %s1943_s0, %s1111_s12 }
  0x18   : > { %1325 = vpow2.f32 %v389_v5  ;;  %v369_v15 = vmul.f32 1.442695, %v349_v14  ;;  %v383_v17 = vmul.f32 1.442695, %v356_v16  ;;  %v367_v19 = vmul.f32 1.442695, %v348_v18 }
  0x19   : > { %1327 = vpow2.f32 %v373_v7  ;;  %v355_v20 = vld [vmem:[%s1946_s3 + $0x50] sm:$0xff]  ;;  %v354_v24 = vld [vmem:[%s1946_s3 + $0x48] sm:$0xff]  ;;  %v408_v27 = vld [vmem:[%s1947_s4 + $0x78] sm:$0xff]  ;;  %s1859_s12 = scalar_lea.vmem [#allocation2], %s1109_s19 }
  0x1a   : > { %1329 = vpow2.f32 %v387_v9  ;;  %v381_v21 = vmul.f32 1.442695, %v355_v20  ;;  %v347_v22 = vld [vmem:[%s1946_s3 + $0x10] sm:$0xff]  ;;  %v379_v25 = vmul.f32 1.442695, %v354_v24  ;;  %v346_v26 = vld [vmem:[%s1946_s3 + $0x8] sm:$0xff] }
  0x1b   : > { %1331 = vpow2.f32 %v371_v11  ;;  %v365_v23 = vmul.f32 1.442695, %v347_v22  ;;  %v363_v28 = vmul.f32 1.442695, %v346_v26  ;;  %v353_v29 = vld [vmem:[%s1946_s3 + $0x40] sm:$0xff]  ;;  %v344_v30 = vld [vmem:[%s1945_s2 + $0x78] sm:$0xff] }
  0x1c   : > { %1333 = vpow2.f32 %v385_v13  ;;  %v400_v31 = vld [vmem:[%s1947_s4 + $0x38] sm:$0xff]  ;;  %v377_v32 = vmul.f32 1.442695, %v353_v29  ;;  %v345_v33 = vld [vmem:[%s1946_s3] sm:$0xff]  ;;  %v407_v35 = vld [vmem:[%s1947_s4 + $0x70] sm:$0xff]  ;;  %s1031_s26 = sshll.u32 %s1859_s12, 4  ;;  %s1897_s26 = int_to_ptr.vmem [resolvable:$true] %s1031_s26 }
  0x1d   : > { %1335 = vpow2.f32 %v369_v15  ;;  %v361_v36 = vmul.f32 1.442695, %v345_v33  ;;  %v464_v37 = vld [vmem:[%s1591_s24] sm:$0xff]  ;;  %v336_v41 = vld [vmem:[%s1945_s2 + $0x38] sm:$0xff]  ;;  %v399_v42 = vld [vmem:[%s1947_s4 + $0x30] sm:$0xff]  ;;  %s1387_s20 = scalar_lea.vmem %s1897_s26, 2048  ;;  %p1394_p0 = scmp.lt.s32.totalorder %s1897_s26, %s1392_s22 }
  0x1e   : > { %1337 = vpow2.f32 %v383_v17  ;;  %v448_v38 = vld [vmem:[%s1596_s10] sm:$0xff]  ;;  %1216 = vmatprep.mubr.msk.f32.mxu0 %vm480_vm0, %v464_v37  ;;  %v343_v45 = vld [vmem:[%s1945_s2 + $0x70] sm:$0xff]  ;;  %v406_v46 = vld [vmem:[%s1947_s4 + $0x68] sm:$0xff]  ;;  %p1388_p11 = scmp.ne.s32.totalorder %s1897_s26, %s1387_s20 }
  0x1f   : > { %1339 = vpow2.f32 %v367_v19  ;;  %1256 = vmatprep.mubr.msk.f32.mxu1 %vm480_vm0, %v448_v38  ;;  %v335_v50 = vld [vmem:[%s1945_s2 + $0x30] sm:$0xff]  ;;  %v398_v51 = vld [vmem:[%s1947_s4 + $0x28] sm:$0xff]  ;;  %v405_v56 = vld [vmem:[%s1947_s4 + $0x60] sm:$0xff] }
  0x20   : > { %1341 = vpow2.f32 %v381_v21  ;;  %v342_v55 = vld [vmem:[%s1945_s2 + $0x68] sm:$0xff]  ;;  %v397_v61 = vld [vmem:[%s1947_s4 + $0x20] sm:$0xff]  ;;  %v404_v2 = vld [vmem:[%s1947_s4 + $0x58] sm:$0xff]  ;;  %p1389_p12 = pnand %p1388_p11, %p1535_p5 }
  0x21   : > { %1343 = vpow2.f32 %v365_v23  ;;  %v334_v60 = vld [vmem:[%s1945_s2 + $0x28] sm:$0xff]  ;;  %v341_v1 = vld [vmem:[%s1945_s2 + $0x60] sm:$0xff]  ;;  %v396_v7 = vld [vmem:[%s1947_s4 + $0x18] sm:$0xff] }
  0x22   : > { %1345 = vpow2.f32 %v379_v25  ;;  %v333_v6 = vld [vmem:[%s1945_s2 + $0x20] sm:$0xff]  ;;  %v340_v11 = vld [vmem:[%s1945_s2 + $0x58] sm:$0xff]  ;;  %v403_v12 = vld [vmem:[%s1947_s4 + $0x50] sm:$0xff]  ;;  %p1390_p13 = pneg %p1389_p12 }
  0x23   : > { %v1322_v34 = vpop.eup %1321  ;;  %1347 = vpow2.f32 %v363_v28  ;;  %v332_v16 = vld [vmem:[%s1945_s2 + $0x18] sm:$0xff]  ;;  %v395_v17 = vld [vmem:[%s1947_s4 + $0x10] sm:$0xff]  ;;  %v402_v22 = vld [vmem:[%s1947_s4 + $0x48] sm:$0xff] }
  0x24   : > { %v1324_v39 = vpop.eup %1323  ;;  %v424_v40 = vmul.f32 %v1322_v34, %v408_v27  ;;  %1349 = vpow2.f32 %v377_v32  ;;  %v339_v21 = vld [vmem:[%s1945_s2 + $0x50] sm:$0xff]  ;;  %v394_v27 = vld [vmem:[%s1947_s4 + $0x8] sm:$0xff]  ;;  %v401_v32 = vld [vmem:[%s1947_s4 + $0x40] sm:$0xff] }
  0x25   : > { %v1326_v43 = vpop.eup %1325  ;;  %v416_v44 = vmul.f32 %v1324_v39, %v400_v31  ;;  %1351 = vpow2.f32 %v361_v36  ;;  %v331_v26 = vld [vmem:[%s1945_s2 + $0x10] sm:$0xff]  ;;  %v338_v31 = vld [vmem:[%s1945_s2 + $0x48] sm:$0xff]  ;;  %v393_v37 = vld [vmem:[%s1947_s4] sm:$0xff] }
  0x26   : > { %v1328_v47 = vpop.eup %1327  ;;  %v440_v48 = vadd.f32 %v424_v40, %v344_v30  ;;  %v423_v49 = vmul.f32 %v1326_v43, %v407_v35  ;;  %v330_v36 = vld [vmem:[%s1945_s2 + $0x8] sm:$0xff] }
  0x27   : > { %v1330_v52 = vpop.eup %1329  ;;  %v432_v53 = vadd.f32 %v416_v44, %v336_v41  ;;  %v415_v54 = vmul.f32 %v1328_v47, %v399_v42  ;;  %v337_v41 = vld [vmem:[%s1945_s2 + $0x40] sm:$0xff] }
  0x28   : > { %v1332_v57 = vpop.eup %1331  ;;  %1200 = vmatprep.subr.mxu0 %v440_v48  ;;  %v439_v58 = vadd.f32 %v423_v49, %v343_v45  ;;  %v422_v59 = vmul.f32 %v1330_v52, %v406_v46  ;;  %v329_v45 = vld [vmem:[%s1945_s2] sm:$0xff]  ;;  %v466_v52 = vld [vmem:[%s1591_s24 + $0x10] sm:$0xff] }
  0x29   : > { %v1334_v62 = vpop.eup %1333  ;;  %1240 = vmatprep.subr.mxu1 %v432_v53  ;;  %1201 = vmatpush3.msra.mxu0 %v440_v48  ;;  %v431_v63 = vadd.f32 %v415_v54, %v335_v50  ;;  %v414_v0 = vmul.f32 %v1332_v57, %v398_v51  ;;  %v465_v50 = vld [vmem:[%s1591_s24 + $0x8] sm:$0xff]  ;;  %v467_v54 = vld [vmem:[%s1591_s24 + $0x18] sm:$0xff]  ;;  %v452_v57 = vld [vmem:[%s1596_s10 + $0x20] sm:$0xff] }
  0x2a   : > { %v1336_v3 = vpop.eup %1335  ;;  %1241 = vmatpush3.msra.mxu1 %v432_v53  ;;  %1202 = vmatprep.subr.mxu0 %v439_v58  ;;  %v438_v4 = vadd.f32 %v422_v59, %v342_v55  ;;  %v421_v5 = vmul.f32 %v1334_v62, %v405_v56  ;;  %v449_v51 = vld [vmem:[%s1596_s10 + $0x8] sm:$0xff]  ;;  %v450_v53 = vld [vmem:[%s1596_s10 + $0x10] sm:$0xff]  ;;  %v451_v55 = vld [vmem:[%s1596_s10 + $0x18] sm:$0xff] }
  0x2b   : > { %v1338_v8 = vpop.eup %1337  ;;  %1242 = vmatprep.subr.mxu1 %v431_v63  ;;  %1203 = vmatpush3.msra.mxu0 %v439_v58  ;;  %v430_v9 = vadd.f32 %v414_v0, %v334_v60  ;;  %v413_v10 = vmul.f32 %v1336_v3, %v397_v61  ;;  %v468_v56 = vld [vmem:[%s1591_s24 + $0x20] sm:$0xff]  ;;  %v469_v58 = vld [vmem:[%s1591_s24 + $0x28] sm:$0xff]  ;;  %v470_v60 = vld [vmem:[%s1591_s24 + $0x30] sm:$0xff] }
  0x2c   : > { %v1340_v13 = vpop.eup %1339  ;;  %1243 = vmatpush3.msra.mxu1 %v431_v63  ;;  %1204 = vmatprep.subr.mxu0 %v438_v4  ;;  %v437_v14 = vadd.f32 %v421_v5, %v341_v1  ;;  %v420_v15 = vmul.f32 %v1338_v8, %v404_v2  ;;  %v453_v59 = vld [vmem:[%s1596_s10 + $0x28] sm:$0xff]  ;;  %v454_v61 = vld [vmem:[%s1596_s10 + $0x30] sm:$0xff]  ;;  %v471_v62 = vld [vmem:[%s1591_s24 + $0x38] sm:$0xff] }
  0x2d   : > { %v1342_v18 = vpop.eup %1341  ;;  %1244 = vmatprep.subr.mxu1 %v430_v9  ;;  %1205 = vmatpush3.msra.mxu0 %v438_v4  ;;  %v429_v19 = vadd.f32 %v413_v10, %v333_v6  ;;  %v412_v20 = vmul.f32 %v1340_v13, %v396_v7  ;;  %v455_v63 = vld [vmem:[%s1596_s10 + $0x38] sm:$0xff]  ;;  %v472_v0 = vld [vmem:[%s1591_s24 + $0x40] sm:$0xff]  ;;  %v473_v2 = vld [vmem:[%s1591_s24 + $0x48] sm:$0xff] }
  0x2e   : > { %v1344_v23 = vpop.eup %1343  ;;  %1245 = vmatpush3.msra.mxu1 %v430_v9  ;;  %1206 = vmatprep.subr.mxu0 %v437_v14  ;;  %v436_v24 = vadd.f32 %v420_v15, %v340_v11  ;;  %v419_v25 = vmul.f32 %v1342_v18, %v403_v12  ;;  %v456_v1 = vld [vmem:[%s1596_s10 + $0x40] sm:$0xff]  ;;  %v457_v3 = vld [vmem:[%s1596_s10 + $0x48] sm:$0xff]  ;;  %v474_v4 = vld [vmem:[%s1591_s24 + $0x50] sm:$0xff]  ;;  %v868_v18 = vlaneseq }
  0x2f   : > { %v1346_v28 = vpop.eup %1345  ;;  %1246 = vmatprep.subr.mxu1 %v429_v19  ;;  %1207 = vmatpush3.msra.mxu0 %v437_v14  ;;  %v428_v29 = vadd.f32 %v412_v20, %v332_v16  ;;  %v411_v30 = vmul.f32 %v1344_v23, %v395_v17  ;;  %v458_v5 = vld [vmem:[%s1596_s10 + $0x50] sm:$0xff]  ;;  %v475_v6 = vld [vmem:[%s1591_s24 + $0x58] sm:$0xff]  ;;  %v476_v8 = vld [vmem:[%s1591_s24 + $0x60] sm:$0xff] }
  0x30   : > { %v1348_v33 = vpop.eup %1347  ;;  %1247 = vmatpush3.msra.mxu1 %v429_v19  ;;  %1208 = vmatprep.subr.mxu0 %v436_v24  ;;  %v435_v34 = vadd.f32 %v419_v25, %v339_v21  ;;  %v418_v35 = vmul.f32 %v1346_v28, %v402_v22  ;;  %v459_v7 = vld [vmem:[%s1596_s10 + $0x58] sm:$0xff]  ;;  %v460_v9 = vld [vmem:[%s1596_s10 + $0x60] sm:$0xff]  ;;  %v477_v10 = vld [vmem:[%s1591_s24 + $0x68] sm:$0xff]  ;;  %v869_v22 = vshrl.u32 %v868_v18, 7 }
  0x31   : > { %v1350_v38 = vpop.eup %1349  ;;  %1248 = vmatprep.subr.mxu1 %v428_v29  ;;  %1209 = vmatpush3.msra.mxu0 %v436_v24  ;;  %v427_v39 = vadd.f32 %v411_v30, %v331_v26  ;;  %v410_v40 = vmul.f32 %v1348_v33, %v394_v27  ;;  %v461_v11 = vld [vmem:[%s1596_s10 + $0x68] sm:$0xff]  ;;  %v478_v12 = vld [vmem:[%s1591_s24 + $0x70] sm:$0xff]  ;;  %v479_v14 = vld [vmem:[%s1591_s24 + $0x78] sm:$0xff]  ;;  %s1393_s24 = scalar_lea.vmem %s1392_s22, 4096 }
  0x32   : > { %v1352_v42 = vpop.eup %1351  ;;  %1249 = vmatpush3.msra.mxu1 %v428_v29  ;;  %1210 = vmatprep.subr.mxu0 %v435_v34  ;;  %v434_v43 = vadd.f32 %v418_v35, %v338_v31  ;;  %v417_v44 = vmul.f32 %v1350_v38, %v401_v32  ;;  %v462_v13 = vld [vmem:[%s1596_s10 + $0x70] sm:$0xff]  ;;  %v463_v15 = vld [vmem:[%s1596_s10 + $0x78] sm:$0xff]  ;;  %v442_v16 = vld [vmem:[%s1949_s6] sm:$0x1]  ;;  %v870_v25 = vsub.s32 0, %v869_v22  ;;  %p1395_p1 = scmp.lt.s32.totalorder %s1393_s24, %s1387_s20 }
  0x33   : > { %1250 = vmatprep.subr.mxu1 %v427_v39  ;;  %1211 = vmatpush3.msra.mxu0 %v435_v34  ;;  %v426_v46 = vadd.f32 %v410_v40, %v330_v36  ;;  %v409_v47 = vmul.f32 %v1352_v42, %v393_v37  ;;  %v443_v17 = vmul.f32 1.442695, %v442_v16  ;;  %v445_v20 = vld [vmem:[%s1950_s7] sm:$0x1] }
  0x34   : > { %1251 = vmatpush3.msra.mxu1 %v427_v39  ;;  %1212 = vmatprep.subr.mxu0 %v434_v43  ;;  %v433_v48 = vadd.f32 %v417_v44, %v337_v41  ;;  %v441_v23 = vld [vmem:[%s1948_s5] sm:$0x1]  ;;  %p1396_p2 = por %p1395_p1, %p1394_p0 }
  0x35   : > { %1252 = vmatprep.subr.mxu1 %v426_v46  ;;  %1213 = vmatpush3.msra.mxu0 %v434_v43  ;;  %v425_v49 = vadd.f32 %v409_v47, %v329_v45  ;;  %1353 = vpow2.f32 %v443_v17 }
  0x36   : > { %1253 = vmatpush3.msra.mxu1 %v426_v46  ;;  %1214 = vmatprep.subr.mxu0 %v433_v48  ;;  %p1397_p3 = pnand %p1396_p2, %p1390_p13 }
  0x37   : > { %1254 = vmatprep.subr.mxu1 %v425_v49  ;;  %1215 = vmatpush3.msra.mxu0 %v433_v48 }
  0x38   : > { %1255 = vmatpush3.msra.mxu1 %v425_v49  ;;  %1217 = vmatmul.mubr.msk.f32.vlgmr.msra.gmra.mxu0 %vm480_vm0, %v465_v50 }
  0x39   : > { %1257 = vmatmul.mubr.msk.f32.vlgmr.msra.gmra.mxu1 %vm480_vm0, %v449_v51  ;;  %1219 = vmatprep.mubr.msk.f32.mxu0 %vm480_vm0, %v466_v52 }
  0x3a   : > { %1259 = vmatprep.mubr.msk.f32.mxu1 %vm480_vm0, %v450_v53 }
  0x3c   : > { %1220 = vmatmul.mubr.msk.f32.gmra.mxu0 %vm480_vm0, %v467_v54 }
  0x3d   : > { %1260 = vmatmul.mubr.msk.f32.gmra.mxu1 %vm480_vm0, %v451_v55  ;;  %1222 = vmatprep.mubr.msk.f32.mxu0 %vm480_vm0, %v468_v56 }
  0x3e   : > { %1262 = vmatprep.mubr.msk.f32.mxu1 %vm480_vm0, %v452_v57 }
  0x40   : > { %1223 = vmatmul.mubr.msk.f32.gmra.mxu0 %vm480_vm0, %v469_v58 }
  0x41   : > { %1263 = vmatmul.mubr.msk.f32.gmra.mxu1 %vm480_vm0, %v453_v59  ;;  %1225 = vmatprep.mubr.msk.f32.mxu0 %vm480_vm0, %v470_v60 }
  0x42   : > { %1265 = vmatprep.mubr.msk.f32.mxu1 %vm480_vm0, %v454_v61  ;;  %v1354_v19 = vpop.eup %1353 }
  0x43   : > { %v446_v21 = vmul.f32 %v1354_v19, %v445_v20 }
  0x44   : > { %1226 = vmatmul.mubr.msk.f32.gmra.mxu0 %vm480_vm0, %v471_v62 }
  0x45   : > { %1266 = vmatmul.mubr.msk.f32.gmra.mxu1 %vm480_vm0, %v455_v63  ;;  %1228 = vmatprep.mubr.msk.f32.mxu0 %vm480_vm0, %v472_v0  ;;  %v447_v24 = vadd.f32 %v446_v21, %v441_v23 }
  0x46   : > { %1268 = vmatprep.mubr.msk.f32.mxu1 %vm480_vm0, %v456_v1 }
  0x47   : > { %v1773_v27 = vrot.slane %v447_v24, %v870_v25 }
  0x48   : > { %1229 = vmatmul.mubr.msk.f32.gmra.mxu0 %vm480_vm0, %v473_v2 }
  0x49   : > { %1269 = vmatmul.mubr.msk.f32.gmra.mxu1 %vm480_vm0, %v457_v3  ;;  %1231 = vmatprep.mubr.msk.f32.mxu0 %vm480_vm0, %v474_v4 }
  0x4a   : > { %1271 = vmatprep.mubr.msk.f32.mxu1 %vm480_vm0, %v458_v5 }
  0x4c   : > { %1232 = vmatmul.mubr.msk.f32.gmra.mxu0 %vm480_vm0, %v475_v6 }
  0x4d   : > { %1272 = vmatmul.mubr.msk.f32.gmra.mxu1 %vm480_vm0, %v459_v7  ;;  %1234 = vmatprep.mubr.msk.f32.mxu0 %vm480_vm0, %v476_v8 }
  0x4e   : > { %1274 = vmatprep.mubr.msk.f32.mxu1 %vm480_vm0, %v460_v9 }
  0x50   : > { %1235 = vmatmul.mubr.msk.f32.gmra.mxu0 %vm480_vm0, %v477_v10 }
  0x51   : > { %1275 = vmatmul.mubr.msk.f32.gmra.mxu1 %vm480_vm0, %v461_v11  ;;  %1237 = vmatprep.mubr.msk.f32.mxu0 %vm480_vm0, %v478_v12 }
  0x52   : > { %1277 = vmatprep.mubr.msk.f32.mxu1 %vm480_vm0, %v462_v13 }
  0x54   : > { %1238 = vmatmul.mubr.msk.f32.gmra.mxu0 %vm480_vm0, %v479_v14 }
  0x55   : > { %1278 = vmatmul.mubr.msk.f32.gmra.mxu1 %vm480_vm0, %v463_v15 }
  0xf8   : > { %v1218_v26 = vpop.f32.mrf.mxu0 }
  0xf9   : > { %v1258_v28 = vpop.f32.mrf.mxu1 }
  0xfa   : > { %v794_v29 = vadd.f32 %v1258_v28, %v1218_v26  ;;  %v595_v30 = vpop.f32.mrf.mxu0 }
  0xfb   : > { %v788_v31 = vpop.f32.mrf.mxu1 }
  0xfc   : > { %v789_v32 = vadd.f32 %v788_v31, %v595_v30  ;;  %v1221_v33 = vpop.f32.mrf.mxu0  ;;  %v1776_v34 = vadd.f32 %v1773_v27, %v794_v29 }
  0xfd   : > { %v1261_v35 = vpop.f32.mrf.mxu1 }
  0xfe   : > { %v1779_v36 = vadd.f32 %v1773_v27, %v789_v32  ;;  %v804_v37 = vadd.f32 %v1261_v35, %v1221_v33  ;;  %v605_v38 = vpop.f32.mrf.mxu0  ;;  %v890_v39 = vmul.f32 %v1776_v34, %v1776_v34 }
  0xff   : > { %v798_v40 = vpop.f32.mrf.mxu1 }
 0x100   : > { %v799_v41 = vadd.f32 %v798_v40, %v605_v38  ;;  %907 = vadd.xlane.f32.xlu0 %v890_v39  ;;  %v1224_v42 = vpop.f32.mrf.mxu0  ;;  %v1784_v43 = vadd.f32 %v1773_v27, %v804_v37  ;;  %v889_v49 = vmul.f32 %v1779_v36, %v1779_v36 }
 0x101   : > { %v1264_v44 = vpop.f32.mrf.mxu1 }
 0x102   : > { %v1787_v45 = vadd.f32 %v1773_v27, %v799_v41  ;;  %v814_v46 = vadd.f32 %v1264_v44, %v1224_v42  ;;  %v615_v47 = vpop.f32.mrf.mxu0  ;;  %v892_v48 = vmul.f32 %v1784_v43, %v1784_v43 }
 0x103   : > { %v808_v50 = vpop.f32.mrf.mxu1 }
 0x104   : > { %v809_v51 = vadd.f32 %v808_v50, %v615_v47  ;;  %911 = vadd.xlane.f32.xlu1 %v892_v48  ;;  %905 = vadd.xlane.f32.xlu0 %v889_v49  ;;  %v1227_v52 = vpop.f32.mrf.mxu0  ;;  %v1794_v54 = vadd.f32 %v1773_v27, %v814_v46  ;;  %v891_v58 = vmul.f32 %v1787_v45, %v1787_v45 }
 0x105   : > { %v1267_v53 = vpop.f32.mrf.mxu1 }
 0x106   : > { %v1797_v55 = vadd.f32 %v1773_v27, %v809_v51  ;;  %v824_v56 = vadd.f32 %v1267_v53, %v1227_v52  ;;  %v625_v57 = vpop.f32.mrf.mxu0  ;;  %v894_v4 = vmul.f32 %v1794_v54, %v1794_v54 }
 0x107   : > { %v818_v59 = vpop.f32.mrf.mxu1 }
 0x108   : > { %v819_v60 = vadd.f32 %v818_v59, %v625_v57  ;;  %909 = vadd.xlane.f32.xlu1 %v891_v58  ;;  %v1230_v61 = vpop.f32.mrf.mxu0  ;;  %v893_v62 = vmul.f32 %v1797_v55, %v1797_v55  ;;  %v1804_v0 = vadd.f32 %v1773_v27, %v824_v56 }
 0x109   : > { %v1270_v63 = vpop.f32.mrf.mxu1 }
 0x10a   : > { %v1807_v1 = vadd.f32 %v1773_v27, %v819_v60  ;;  %v834_v2 = vadd.f32 %v1270_v63, %v1230_v61  ;;  %913 = vadd.xlane.f32.xlu0 %v893_v62  ;;  %v635_v3 = vpop.f32.mrf.mxu0  ;;  %v896_v14 = vmul.f32 %v1804_v0, %v1804_v0 }
 0x10b   : > { %v828_v5 = vpop.f32.mrf.mxu1 }
 0x10c   : > { %v829_v6 = vadd.f32 %v828_v5, %v635_v3  ;;  %915 = vadd.xlane.f32.xlu1 %v894_v4  ;;  %v1233_v7 = vpop.f32.mrf.mxu0  ;;  %v895_v8 = vmul.f32 %v1807_v1, %v1807_v1  ;;  %v1814_v10 = vadd.f32 %v1773_v27, %v834_v2 }
 0x10d   : > { %v1273_v9 = vpop.f32.mrf.mxu1 }
 0x10e   : > { %v1817_v11 = vadd.f32 %v1773_v27, %v829_v6  ;;  %v844_v12 = vadd.f32 %v1273_v9, %v1233_v7  ;;  %917 = vadd.xlane.f32.xlu0 %v895_v8  ;;  %v645_v13 = vpop.f32.mrf.mxu0  ;;  %v898_v24 = vmul.f32 %v1814_v10, %v1814_v10 }
 0x10f   : > { %v838_v15 = vpop.f32.mrf.mxu1 }
 0x110   : > { %v839_v16 = vadd.f32 %v838_v15, %v645_v13  ;;  %919 = vadd.xlane.f32.xlu1 %v896_v14  ;;  %v1236_v17 = vpop.f32.mrf.mxu0  ;;  %v897_v18 = vmul.f32 %v1817_v11, %v1817_v11  ;;  %v1824_v20 = vadd.f32 %v1773_v27, %v844_v12 }
 0x111   : > { %v1276_v19 = vpop.f32.mrf.mxu1 }
 0x112   : > { %v1827_v21 = vadd.f32 %v1773_v27, %v839_v16  ;;  %v854_v22 = vadd.f32 %v1276_v19, %v1236_v17  ;;  %921 = vadd.xlane.f32.xlu0 %v897_v18  ;;  %v655_v23 = vpop.f32.mrf.mxu0  ;;  %v900_v37 = vmul.f32 %v1824_v20, %v1824_v20 }
 0x113   : > { %v848_v25 = vpop.f32.mrf.mxu1 }
 0x114   : > { %v849_v26 = vadd.f32 %v848_v25, %v655_v23  ;;  %923 = vadd.xlane.f32.xlu1 %v898_v24  ;;  %v1239_v28 = vpop.f32.mrf.mxu0  ;;  %v899_v29 = vmul.f32 %v1827_v21, %v1827_v21  ;;  %v1834_v31 = vadd.f32 %v1773_v27, %v854_v22 }
 0x115   : > { %v1279_v30 = vpop.f32.mrf.mxu1 }
 0x116   : > { %v1837_v32 = vadd.f32 %v1773_v27, %v849_v26  ;;  %v864_v33 = vadd.f32 %v1279_v30, %v1239_v28  ;;  %925 = vadd.xlane.f32.xlu0 %v899_v29  ;;  %v665_v35 = vpop.f32.mrf.mxu0  ;;  %v902_v44 = vmul.f32 %v1834_v31, %v1834_v31 }
 0x117   : > { %v858_v38 = vpop.f32.mrf.mxu1 }
 0x118   : > { %v859_v39 = vadd.f32 %v858_v38, %v665_v35  ;;  %927 = vadd.xlane.f32.xlu1 %v900_v37  ;;  %v901_v40 = vmul.f32 %v1837_v32, %v1837_v32  ;;  %v1844_v41 = vadd.f32 %v1773_v27, %v864_v33 }
 0x11a   : > { %v1847_v42 = vadd.f32 %v1773_v27, %v859_v39  ;;  %929 = vadd.xlane.f32.xlu0 %v901_v40  ;;  %v904_v47 = vmul.f32 %v1844_v41, %v1844_v41 }
 0x11c   : > { %931 = vadd.xlane.f32.xlu1 %v902_v44  ;;  %v903_v46 = vmul.f32 %v1847_v42, %v1847_v42 }
 0x11e   : > { %933 = vadd.xlane.f32.xlu0 %v903_v46 }
 0x120   : > { %935 = vadd.xlane.f32.xlu1 %v904_v47 }
 0x189   : > { %v908_v48 = vpop.xlane.xlu0 %907 }
 0x18a   : > { %v938_v49 = vmax.f32 %v908_v48, 1e-24 }
 0x18c   : > { %1355 = vrsqrt.f32 %v938_v49 }
 0x18d   : > { %v912_v50 = vpop.xlane.xlu1 %911  ;;  %v906_v27 = vpop.xlane.xlu0 %905 }
 0x18e   : > { %v940_v51 = vmax.f32 %v912_v50, 1e-24  ;;  %v937_v52 = vmax.f32 %v906_v27, 1e-24 }
 0x190   : > { %1357 = vrsqrt.f32 %v940_v51 }
 0x191   : > { %1359 = vrsqrt.f32 %v937_v52  ;;  %v910_v53 = vpop.xlane.xlu1 %909 }
 0x192   : > { %v939_v56 = vmax.f32 %v910_v53, 1e-24 }
 0x193   : > { %v914_v57 = vpop.xlane.xlu0 %913 }
 0x194   : > { %1361 = vrsqrt.f32 %v939_v56  ;;  %v941_v58 = vmax.f32 %v914_v57, 1e-24 }
 0x195   : > { %v916_v59 = vpop.xlane.xlu1 %915 }
 0x196   : > { %1363 = vrsqrt.f32 %v941_v58  ;;  %v942_v60 = vmax.f32 %v916_v59, 1e-24 }
 0x197   : > { %v918_v61 = vpop.xlane.xlu0 %917 }
 0x198   : > { %1365 = vrsqrt.f32 %v942_v60  ;;  %v943_v62 = vmax.f32 %v918_v61, 1e-24 }
 0x199   : > { %v1356_v63 = vpop.eup %1355  ;;  %v920_v2 = vpop.xlane.xlu1 %919 }
 0x19a   : > { %v970_v3 = vmul.f32 %v1356_v63, %v1776_v34  ;;  %1367 = vrsqrt.f32 %v943_v62  ;;  %v944_v4 = vmax.f32 %v920_v2, 1e-24 }
 0x19b   : > { %v922_v5 = vpop.xlane.xlu0 %921 }
 0x19c   : > { %v986_v6 = vmax.f32 %v970_v3, 0.0  ;;  %1369 = vrsqrt.f32 %v944_v4  ;;  %v945_v7 = vmax.f32 %v922_v5, 1e-24 }
 0x19d   : > { %v1358_v8 = vpop.eup %1357  ;;  %v924_v9 = vpop.xlane.xlu1 %923 }
 0x19e   : > { %v1360_v12 = vpop.eup %1359  ;;  %1002 = vst [vmem:[%s1859_s12 + $0x8] sm:$0xff] %v986_v6  ;;  %v972_v13 = vmul.f32 %v1358_v8, %v1784_v43  ;;  %1371 = vrsqrt.f32 %v945_v7  ;;  %v946_v14 = vmax.f32 %v924_v9, 1e-24 }
 0x19f   : > { %v969_v34 = vmul.f32 %v1360_v12, %v1779_v36  ;;  %v926_v15 = vpop.xlane.xlu0 %925 }
 0x1a0   : > { %v988_v16 = vmax.f32 %v972_v13, 0.0  ;;  %1373 = vrsqrt.f32 %v946_v14  ;;  %v947_v17 = vmax.f32 %v926_v15, 1e-24 }
 0x1a1   : > { %v1362_v18 = vpop.eup %1361  ;;  %v985_v19 = vmax.f32 %v969_v34, 0.0  ;;  %v928_v22 = vpop.xlane.xlu1 %927 }
 0x1a2   : > { %1004 = vst [vmem:[%s1859_s12 + $0x18] sm:$0xff] %v988_v16  ;;  %v971_v23 = vmul.f32 %v1362_v18, %v1787_v45  ;;  %1375 = vrsqrt.f32 %v947_v17  ;;  %v948_v24 = vmax.f32 %v928_v22, 1e-24 }
 0x1a3   : > { %v1364_v25 = vpop.eup %1363  ;;  %1001 = vst [vmem:[%s1859_s12] sm:$0xff] %v985_v19  ;;  %v930_v43 = vpop.xlane.xlu0 %929 }
 0x1a4   : > { %v987_v26 = vmax.f32 %v971_v23, 0.0  ;;  %v973_v36 = vmul.f32 %v1364_v25, %v1797_v55  ;;  %1377 = vrsqrt.f32 %v948_v24  ;;  %v949_v28 = vmax.f32 %v930_v43, 1e-24 }
 0x1a5   : > { %v1366_v29 = vpop.eup %1365  ;;  %v932_v30 = vpop.xlane.xlu1 %931 }
 0x1a6   : > { %1003 = vst [vmem:[%s1859_s12 + $0x10] sm:$0xff] %v987_v26  ;;  %v989_v33 = vmax.f32 %v973_v36, 0.0  ;;  %v974_v35 = vmul.f32 %v1366_v29, %v1794_v54  ;;  %1379 = vrsqrt.f32 %v949_v28  ;;  %v950_v45 = vmax.f32 %v932_v30, 1e-24 }
 0x1a7   : > { %v1368_v37 = vpop.eup %1367  ;;  %v934_v38 = vpop.xlane.xlu0 %933 }
 0x1a8   : > { %1005 = vst [vmem:[%s1859_s12 + $0x20] sm:$0xff] %v989_v33  ;;  %v990_v39 = vmax.f32 %v974_v35, 0.0  ;;  %v975_v40 = vmul.f32 %v1368_v37, %v1807_v1  ;;  %1381 = vrsqrt.f32 %v950_v45  ;;  %v951_v55 = vmax.f32 %v934_v38, 1e-24 }
 0x1a9   : > { %v1370_v44 = vpop.eup %1369  ;;  %v936_v46 = vpop.xlane.xlu1 %935 }
 0x1aa   : > { %1006 = vst [vmem:[%s1859_s12 + $0x28] sm:$0xff] %v990_v39  ;;  %v991_v47 = vmax.f32 %v975_v40, 0.0  ;;  %v976_v48 = vmul.f32 %v1370_v44, %v1804_v0  ;;  %1383 = vrsqrt.f32 %v951_v55  ;;  %v952_v54 = vmax.f32 %v936_v46, 1e-24 }
 0x1ab   : > { %v1372_v49 = vpop.eup %1371 }
 0x1ac   : > { %1007 = vst [vmem:[%s1859_s12 + $0x30] sm:$0xff] %v991_v47  ;;  %v992_v50 = vmax.f32 %v976_v48, 0.0  ;;  %v977_v27 = vmul.f32 %v1372_v49, %v1817_v11  ;;  %1385 = vrsqrt.f32 %v952_v54 }
 0x1ad   : > { %v1374_v1 = vpop.eup %1373 }
 0x1ae   : > { %1008 = vst [vmem:[%s1859_s12 + $0x38] sm:$0xff] %v992_v50  ;;  %v993_v51 = vmax.f32 %v977_v27, 0.0  ;;  %v978_v52 = vmul.f32 %v1374_v1, %v1814_v10 }
 0x1af   : > { %v1376_v53 = vpop.eup %1375 }
 0x1b0   : > { %1009 = vst [vmem:[%s1859_s12 + $0x40] sm:$0xff] %v993_v51  ;;  %v994_v0 = vmax.f32 %v978_v52, 0.0  ;;  %v979_v56 = vmul.f32 %v1376_v53, %v1827_v21 }
 0x1b1   : > { %v1378_v57 = vpop.eup %1377 }
 0x1b2   : > { %1010 = vst [vmem:[%s1859_s12 + $0x48] sm:$0xff] %v994_v0  ;;  %v995_v58 = vmax.f32 %v979_v56, 0.0  ;;  %v980_v11 = vmul.f32 %v1378_v57, %v1824_v20 }
 0x1b3   : > { %v1380_v59 = vpop.eup %1379 }
 0x1b4   : > { %1011 = vst [vmem:[%s1859_s12 + $0x50] sm:$0xff] %v995_v58  ;;  %v996_v60 = vmax.f32 %v980_v11, 0.0  ;;  %v981_v61 = vmul.f32 %v1380_v59, %v1837_v32 }
 0x1b5   : > { %v1382_v10 = vpop.eup %1381 }
 0x1b6   : > { %1012 = vst [vmem:[%s1859_s12 + $0x58] sm:$0xff] %v996_v60  ;;  %v997_v62 = vmax.f32 %v981_v61, 0.0  ;;  %v982_v21 = vmul.f32 %v1382_v10, %v1834_v31 }
 0x1b7   : > { %v1384_v63 = vpop.eup %1383 }
 0x1b8   : > { %1013 = vst [vmem:[%s1859_s12 + $0x60] sm:$0xff] %v997_v62  ;;  %v998_v2 = vmax.f32 %v982_v21, 0.0  ;;  %v983_v20 = vmul.f32 %v1384_v63, %v1847_v42 }
 0x1b9   : > { %v1386_v3 = vpop.eup %1385 }
 0x1ba   : > { %1014 = vst [vmem:[%s1859_s12 + $0x68] sm:$0xff] %v998_v2  ;;  %v999_v4 = vmax.f32 %v983_v20, 0.0  ;;  %v984_v32 = vmul.f32 %v1386_v3, %v1844_v41 }
 0x1bc   : > { %1015 = vst [vmem:[%s1859_s12 + $0x70] sm:$0xff] %v999_v4  ;;  %v1000_v31 = vmax.f32 %v984_v32, 0.0 }
 0x1be   : > { %1016 = vst [vmem:[%s1859_s12 + $0x78] sm:$0xff] %v1000_v31 }
 0x1bf   : > { %1400 = shalt.err (!%p1397_p3)
}
 0x1c0   : > { %s1401_s10 = scalar_lea.hbm %s1895_s18, 2048  ;;  %s1405_s12 = scalar_lea.hbm %s1951_s8, 8192 }
 0x1c1   : > { %p1402_p4 = scmp.ne.s32.totalorder %s1895_s18, %s1401_s10  ;;  %p1406_p9 = scmp.lt.s32.totalorder %s1895_s18, %s1951_s8 }
 0x1c2   : > { %p1407_p10 = scmp.lt.s32.totalorder %s1405_s12, %s1401_s10 }
 0x1c3   : > { %p1403_p7 = pnand %p1402_p4, %p1535_p5 }
 0x1c4   : > { %p1408_p11 = por %p1407_p10, %p1406_p9 }
 0x1c5   : > { %p1404_p8 = pneg %p1403_p7 }
 0x1c7   : > { %p1409_p12 = pnand %p1408_p11, %p1404_p8 }
 0x1c9   : > { %1412 = shalt.err (!%p1409_p12)
}
 0x1ca   : > { %s1450_s17 = smov 128   ;;  %s1451_s20 = smov 8  }
 0x1cb   : > { %1280 = dma.vmem_to_hbm [thread:$0]  (%p1535_p5), %s1897_s26, 2048, %s1895_s18, %s1903_s9, %s1450_s17, %s1450_s17, %s1451_s20  }
 0x1cc PF: > { %p1286_p13 = scmp.ge.s32.totalorder %s1447_s30, 2  ;;  %s1046_s21 = sand.u32 1, %s1435_s27  }
 0x1cd   : > { %s1047_s22 = scalar_lea.sflag [#allocation3], %s1046_s21 }
 0x1ce   : > { %p1283_p0 = pnand %p1286_p13, %p1539_p6 }
 0x1d0   : > { %p1284_p1 = pneg %p1283_p0 }
 0x1d2   : > { %1430 = dma.done.wait (%p1284_p1), %s1047_s22, 2048  }
 0x1d3   : > { %1432 = vsyncadd (%p1284_p1), %s1047_s22, 4294965248  ;;  %p18_p2 = scmp.ge.s32.totalorder %s1522_s11, 6   ;;  %s1954_s27 = smov %s1439_s28 }
 0x1d4   : > { %s1955_s28 = smov %s1443_s29  ;;  %s1956_s29 = smov %s1533_s14 }
 0x1d5   : > { %s1957_s30 = smov %s1522_s11  ;;  %20 = sbr.rel (!%p18_p2) target bundleno = 3 (0x3), region = 90 }
 0x1da   :  { %1052 = vsyncpa [#allocation3], 1 }
 0x1db   :  { %1054 = vsyncpa [#allocation3 + $0x1], 1 }

</bundles_post_ra>
